<compile_context>
chip_gen: v7x
topology: tpu7x:2x2x1
jax: 0.10.0
libtpu: 0.0.40
codegen_flags: <defaults>
</compile_context>

<pallas_src>
import functools

import jax
import jax.numpy as jnp
from jax import lax
from jax.experimental import pallas as pl
from jax.experimental.pallas import tpu as pltpu


def _upsample_conv_kernel(x_ref, halo_ref, w_ref, b_ref, o_ref):
    # x_ref:    (TL, C)   input rows x[t*TL : (t+1)*TL]     (NLC layout)
    # halo_ref: (2, C)    row 0 = x[t*TL - 1] (or 0),  row 1 = x[(t+1)*TL] (or 0)
    # w_ref:    (4, C, C) folded taps [A0, A1+A2, A0+A1, A2], A_k maps c_in -> c_out
    # b_ref:    (1, C)    bias
    # o_ref:    (2*TL, C) interleaved (even, odd) output rows
    TL, C = x_ref.shape
    x = x_ref[...]
    halo = halo_ref[...]

    # Shifted neighbors with halo rows (zeros at the true sequence boundaries).
    x_prev = jnp.concatenate([halo[0:1, :], x[: TL - 1, :]], axis=0)   # x[i-1]
    x_next = jnp.concatenate([x[1:, :], halo[1:2, :]], axis=0)         # x[i+1]

    # Folded-weight fused (nearest x2 upsample) o (conv k=3, padding='same').
    even = jnp.dot(x_prev, w_ref[0], preferred_element_type=jnp.float32)
    even = even + jnp.dot(x, w_ref[1], preferred_element_type=jnp.float32)
    odd = jnp.dot(x, w_ref[2], preferred_element_type=jnp.float32)
    odd = odd + jnp.dot(x_next, w_ref[3], preferred_element_type=jnp.float32)

    bias = b_ref[...].astype(jnp.float32)                              # (1, C)
    even = even + bias
    odd = odd + bias

    # Interleave even/odd along the sublane (length) axis; lane dim (C) untouched.
    inter = jnp.stack([even, odd], axis=1)                             # (TL, 2, C)
    o_ref[...] = inter.reshape(2 * TL, C).astype(o_ref.dtype)


def _pick_length_tile(L):
    # Largest convenient tile that divides L; whole length for small/irregular L.
    for t in (1024, 512, 256, 128):
        if L >= t and L % t == 0:
            return t
    return L


@functools.partial(jax.jit, static_argnames=("scale_factor", "compute_dtype"))
def upsample_block_forward(x, w, b, scale_factor=2.0, compute_dtype=None):
    """x: (N, C, L); w: (C, C, 3) (out, in, tap); b: (C,).  Returns (N, C, 2L)."""
    # TODO(synk): kernel is specialized to the module default scale_factor=2.0
    # (nearest); other scale factors are not implemented here.
    assert scale_factor == 2.0, "kernel specialized to nearest x2 upsampling"
    N, C, L = x.shape
    L2 = 2 * L

    TL = _pick_length_tile(L)
    n_tiles = L // TL

    # NLC layout for the kernel (length on sublanes, channels on lanes).
    x_nlc = jnp.transpose(x, (0, 2, 1))                                # (N, L, C)

    # Per-tile halo rows: left = x[t*TL - 1], right = x[(t+1)*TL], zeros at edges.
    zero_row = jnp.zeros((N, 1, C), x.dtype)
    lefts = jnp.concatenate(
        [zero_row, x_nlc[:, TL - 1:L - 1:TL, :]], axis=1)              # (N, n_tiles, C)
    rights = jnp.concatenate(
        [x_nlc[:, TL:L:TL, :], zero_row], axis=1)                      # (N, n_tiles, C)
    halo = jnp.stack([lefts, rights], axis=2)                          # (N, n_tiles, 2, C)

    # Folded weights: A_k = w[:, :, k].T maps (c_in -> c_out) for right-multiplication.
    A = jnp.transpose(w, (2, 1, 0))                                    # (3, C, C)
    w_folded = jnp.stack([A[0], A[1] + A[2], A[0] + A[1], A[2]], axis=0)  # (4, C, C)
    b2 = b.reshape(1, C)

    if compute_dtype is not None:  # e.g. jnp.bfloat16 on v6e/v7x; acc stays f32.
        x_nlc = x_nlc.astype(compute_dtype)
        halo = halo.astype(compute_dtype)
        w_folded = w_folded.astype(compute_dtype)

    out_nlc = pl.pallas_call(
        _upsample_conv_kernel,
        out_shape=jax.ShapeDtypeStruct((N, L2, C), x.dtype),
        grid=(N, n_tiles),
        in_specs=[
            pl.BlockSpec((pl.Squeezed(), TL, C), lambda n, t: (n, t, 0)),
            pl.BlockSpec((pl.Squeezed(), pl.Squeezed(), 2, C),
                         lambda n, t: (n, t, 0, 0)),
            pl.BlockSpec((4, C, C), lambda n, t: (0, 0, 0)),
            pl.BlockSpec((1, C), lambda n, t: (0, 0)),
        ],
        out_specs=pl.BlockSpec((pl.Squeezed(), 2 * TL, C), lambda n, t: (n, t, 0)),
        compiler_params=pltpu.CompilerParams(
            dimension_semantics=("parallel", "parallel"),
            vmem_limit_bytes=64 * 1024 * 1024,
        ),
    )(x_nlc, halo, w_folded, b2)

    return jnp.transpose(out_nlc, (0, 2, 1))                           # back to NCL


def _reference_forward(x, w, b, scale_factor=2.0):
    """Pure-JAX reference mirroring the PyTorch forward (exact integer nearest idx)."""
    N, C, L = x.shape
    L2 = int(round(L * scale_factor))
    idx = (jnp.arange(L2) * L) // L2                                   # floor(l * in/out)
    x_up = x[:, :, idx]
    out = lax.conv_general_dilated(
        x_up, w, window_strides=(1,), padding="SAME",
        dimension_numbers=("NCH", "OIH", "NCH"),
    )
    return out + b[None, :, None]


if __name__ == "__main__":
    # Small shapes consistent with the module: batch=2, channels=4, length=16.
    N, C, L = 2, 4, 16
    key = jax.random.PRNGKey(0)
    kx, kw, kb = jax.random.split(key, 3)

    x = jax.random.normal(kx, (N, C, L), dtype=jnp.float32)

    # Deterministic Conv1d params (PyTorch-style uniform init bounds), shape (C, C, 3).
    fan_in = C * 3
    bound = 1.0 / (fan_in ** 0.5)
    w = jax.random.uniform(kw, (C, C, 3), minval=-bound, maxval=bound,
                           dtype=jnp.float32)
    b = jax.random.uniform(kb, (C,), minval=-bound, maxval=bound,
                           dtype=jnp.float32)

    out = upsample_block_forward(x, w, b)
    out = jax.block_until_ready(out)

    ref = _reference_forward(x, w, b, scale_factor=2.0)
    assert out.shape == (N, C, 2 * L), out.shape
    assert jnp.allclose(out, ref, atol=1e-5, rtol=1e-5), (
        float(jnp.max(jnp.abs(out - ref)))
    )
    print("KERNEL_OK")
</pallas_src>

<mosaic_0001>
module attributes {stable_mosaic.version = 11 : i64} {
  func.func @_upsample_conv_kernel(%arg0: i32, %arg1: i32, %arg2: memref<1x16x4xf32, #tpu.memory_space<vmem>>, %arg3: memref<1x1x2x4xf32, #tpu.memory_space<vmem>>, %arg4: memref<4x4x4xf32, #tpu.memory_space<vmem>>, %arg5: memref<1x4xf32, #tpu.memory_space<vmem>>, %arg6: memref<1x32x4xf32, #tpu.memory_space<vmem>>) attributes {dimension_semantics = [#tpu.dimension_semantics<parallel>, #tpu.dimension_semantics<parallel>], iteration_bounds = array<i64: 2, 1>, scalar_prefetch = 0 : i64, scratch_operands = 0 : i64, tpu.core_type = #tpu.core_type<tc>, window_params = [{transform_indices = @transform_0, window_bounds = array<i64: 1, 16, 4>}, {transform_indices = @transform_1, window_bounds = array<i64: 1, 1, 2, 4>}, {pipeline_mode = #tpu.pipeline_mode<synchronous>, transform_indices = @transform_2, window_bounds = array<i64: 4, 4, 4>}, {pipeline_mode = #tpu.pipeline_mode<synchronous>, transform_indices = @transform_3, window_bounds = array<i64: 1, 4>}, {transform_indices = @transform_4, window_bounds = array<i64: 1, 32, 4>}]} {
    %c0 = arith.constant 0 : index
    %c0_0 = arith.constant 0 : index
    %c0_1 = arith.constant 0 : index
    %0 = vector.load %arg2[%c0, %c0_0, %c0_1] : memref<1x16x4xf32, #tpu.memory_space<vmem>>, vector<1x16x4xf32>
    %1 = vector.shape_cast %0 : vector<1x16x4xf32> to vector<16x4xf32>
    %c0_2 = arith.constant 0 : index
    %c0_3 = arith.constant 0 : index
    %c0_4 = arith.constant 0 : index
    %c0_5 = arith.constant 0 : index
    %2 = vector.load %arg3[%c0_2, %c0_3, %c0_4, %c0_5] : memref<1x1x2x4xf32, #tpu.memory_space<vmem>>, vector<1x1x2x4xf32>
    %3 = vector.shape_cast %2 : vector<1x1x2x4xf32> to vector<2x4xf32>
    %4 = vector.extract_strided_slice %3 {offsets = [0, 0], sizes = [1, 4], strides = [1, 1]} : vector<2x4xf32> to vector<1x4xf32>
    %5 = vector.extract_strided_slice %1 {offsets = [0, 0], sizes = [15, 4], strides = [1, 1]} : vector<16x4xf32> to vector<15x4xf32>
    %6 = tpu.concatenate %4, %5 in 0 : vector<1x4xf32>, vector<15x4xf32> -> vector<16x4xf32>
    %7 = vector.extract_strided_slice %1 {offsets = [1, 0], sizes = [15, 4], strides = [1, 1]} : vector<16x4xf32> to vector<15x4xf32>
    %8 = vector.extract_strided_slice %3 {offsets = [1, 0], sizes = [1, 4], strides = [1, 1]} : vector<2x4xf32> to vector<1x4xf32>
    %9 = tpu.concatenate %7, %8 in 0 : vector<15x4xf32>, vector<1x4xf32> -> vector<16x4xf32>
    %c0_6 = arith.constant 0 : index
    %c0_7 = arith.constant 0 : index
    %c0_8 = arith.constant 0 : index
    %10 = vector.load %arg4[%c0_6, %c0_7, %c0_8] : memref<4x4x4xf32, #tpu.memory_space<vmem>>, vector<1x4x4xf32>
    %11 = vector.shape_cast %10 : vector<1x4x4xf32> to vector<4x4xf32>
    %cst = arith.constant dense<0.000000e+00> : vector<16x4xf32>
    %12 = tpu.matmul %6, %11, %cst {dimension_numbers = #tpu.dot_dimension_numbers<[1], [0], [0], [1], [0, 0, 1, 1], [], []>} : vector<16x4xf32>, vector<4x4xf32>, vector<16x4xf32> -> vector<16x4xf32>
    %c1 = arith.constant 1 : index
    %c0_9 = arith.constant 0 : index
    %c0_10 = arith.constant 0 : index
    %13 = vector.load %arg4[%c1, %c0_9, %c0_10] : memref<4x4x4xf32, #tpu.memory_space<vmem>>, vector<1x4x4xf32>
    %14 = vector.shape_cast %13 : vector<1x4x4xf32> to vector<4x4xf32>
    %cst_11 = arith.constant dense<0.000000e+00> : vector<16x4xf32>
    %15 = tpu.matmul %1, %14, %cst_11 {dimension_numbers = #tpu.dot_dimension_numbers<[1], [0], [0], [1], [0, 0, 1, 1], [], []>} : vector<16x4xf32>, vector<4x4xf32>, vector<16x4xf32> -> vector<16x4xf32>
    %16 = arith.addf %12, %15 : vector<16x4xf32>
    %c2 = arith.constant 2 : index
    %c0_12 = arith.constant 0 : index
    %c0_13 = arith.constant 0 : index
    %17 = vector.load %arg4[%c2, %c0_12, %c0_13] : memref<4x4x4xf32, #tpu.memory_space<vmem>>, vector<1x4x4xf32>
    %18 = vector.shape_cast %17 : vector<1x4x4xf32> to vector<4x4xf32>
    %cst_14 = arith.constant dense<0.000000e+00> : vector<16x4xf32>
    %19 = tpu.matmul %1, %18, %cst_14 {dimension_numbers = #tpu.dot_dimension_numbers<[1], [0], [0], [1], [0, 0, 1, 1], [], []>} : vector<16x4xf32>, vector<4x4xf32>, vector<16x4xf32> -> vector<16x4xf32>
    %c3 = arith.constant 3 : index
    %c0_15 = arith.constant 0 : index
    %c0_16 = arith.constant 0 : index
    %20 = vector.load %arg4[%c3, %c0_15, %c0_16] : memref<4x4x4xf32, #tpu.memory_space<vmem>>, vector<1x4x4xf32>
    %21 = vector.shape_cast %20 : vector<1x4x4xf32> to vector<4x4xf32>
    %cst_17 = arith.constant dense<0.000000e+00> : vector<16x4xf32>
    %22 = tpu.matmul %9, %21, %cst_17 {dimension_numbers = #tpu.dot_dimension_numbers<[1], [0], [0], [1], [0, 0, 1, 1], [], []>} : vector<16x4xf32>, vector<4x4xf32>, vector<16x4xf32> -> vector<16x4xf32>
    %23 = arith.addf %19, %22 : vector<16x4xf32>
    %c0_18 = arith.constant 0 : index
    %c0_19 = arith.constant 0 : index
    %24 = vector.load %arg5[%c0_18, %c0_19] : memref<1x4xf32, #tpu.memory_space<vmem>>, vector<1x4xf32>
    %25 = vector.broadcast %24 : vector<1x4xf32> to vector<16x4xf32>
    %26 = arith.addf %16, %25 : vector<16x4xf32>
    %27 = vector.broadcast %24 : vector<1x4xf32> to vector<16x4xf32>
    %28 = arith.addf %23, %27 : vector<16x4xf32>
    %29 = vector.shape_cast %26 : vector<16x4xf32> to vector<16x1x4xf32>
    %30 = vector.shape_cast %28 : vector<16x4xf32> to vector<16x1x4xf32>
    %31 = tpu.concatenate %29, %30 in 1 : vector<16x1x4xf32>, vector<16x1x4xf32> -> vector<16x2x4xf32>
    %32 = vector.shape_cast %31 : vector<16x2x4xf32> to vector<32x4xf32>
    %c0_20 = arith.constant 0 : index
    %c0_21 = arith.constant 0 : index
    %c0_22 = arith.constant 0 : index
    %33 = vector.load %arg6[%c0_20, %c0_21, %c0_22] : memref<1x32x4xf32, #tpu.memory_space<vmem>>, vector<1x32x4xf32>
    %34 = vector.shape_cast %33 : vector<1x32x4xf32> to vector<32x4xf32>
    %35 = vector.shape_cast %32 : vector<32x4xf32> to vector<1x32x4xf32>
    tpu.vector_store %arg6[%c0_20, %c0_21, %c0_22], %35 {strides = array<i32>} : memref<1x32x4xf32, #tpu.memory_space<vmem>>, vector<1x32x4xf32>,
    return
  }
  func.func @transform_0(%arg0: i32, %arg1: i32) -> (i32, i32, i32) {
    %c0_i32 = arith.constant 0 : i32
    %c0_i32_0 = arith.constant 0 : i32
    return %arg0, %arg1, %c0_i32 : i32, i32, i32
  }
  func.func @transform_1(%arg0: i32, %arg1: i32) -> (i32, i32, i32, i32) {
    %c0_i32 = arith.constant 0 : i32
    %c0_i32_0 = arith.constant 0 : i32
    %c0_i32_1 = arith.constant 0 : i32
    return %arg0, %arg1, %c0_i32, %c0_i32_0 : i32, i32, i32, i32
  }
  func.func @transform_2(%arg0: i32, %arg1: i32) -> (i32, i32, i32) {
    %c0_i32 = arith.constant 0 : i32
    %c0_i32_0 = arith.constant 0 : i32
    %c0_i32_1 = arith.constant 0 : i32
    %c0_i32_2 = arith.constant 0 : i32
    return %c0_i32, %c0_i32_0, %c0_i32_1 : i32, i32, i32
  }
  func.func @transform_3(%arg0: i32, %arg1: i32) -> (i32, i32) {
    %c0_i32 = arith.constant 0 : i32
    %c0_i32_0 = arith.constant 0 : i32
    %c0_i32_1 = arith.constant 0 : i32
    return %c0_i32, %c0_i32_0 : i32, i32
  }
  func.func @transform_4(%arg0: i32, %arg1: i32) -> (i32, i32, i32) {
    %c0_i32 = arith.constant 0 : i32
    %c0_i32_0 = arith.constant 0 : i32
    return %arg0, %arg1, %c0_i32 : i32, i32, i32
  }
}

</mosaic_0001>

<bundles_post_ra>
// kernel: upsample_block_forward.1
= control target key start
LH: loop header
LB: loop body
LE: loop exit
PB: predicated region body
PF: predicated region fallthrough
CT: control target
= control target key end

     0   :  { %s2057_s0 = inlined_call_operand.hbm [shape: f32[2,16,4], index: 0, kind: input, shape index: {}]   ;;  %s2058_s1 = inlined_call_operand.hbm [shape: f32[2,1,2,4], index: 1, kind: input, shape index: {}]   ;;  %s2059_s2 = inlined_call_operand.hbm [shape: f32[4,4,4], index: 2, kind: input, shape index: {}]   ;;  %s2060_s3 = inlined_call_operand.hbm [shape: f32[1,4], index: 3, kind: input, shape index: {}]   ;;  %s2061_s4 = inlined_call_operand.hbm [shape: f32[2,32,4], index: 4, kind: output, shape index: {}]  }
   0x1   :  { %2067 = sst [smem:[#allocation17_spill]] %s2057_s0 }
   0x2   :  { %2068 = sst [smem:[#allocation18_spill]] %s2059_s2 }
   0x3   :  { %2069 = sst [smem:[#allocation19_spill]] %s2060_s3 }
   0x4   :  { %9 = vsyncpa [#allocation3], 0 }
   0x5   :  { %11 = vsyncpa [#allocation3 + $0x1], 0 }
   0x6   :  { %12 = vsyncpa [#allocation6], 0 }
   0x7   :  { %14 = vsyncpa [#allocation6 + $0x1], 0 }
   0x8   :  { %15 = vsyncpa [#allocation9], 0 }
   0x9   :  { %16 = vsyncpa [#allocation4], 0 }
   0xa   :  { %18 = vsyncpa [#allocation4 + $0x1], 0  ;;  %s1638_s15 = smov 0   ;;  %s1640_s16 = smov 0  }
   0xb   :  { %s1642_s17 = smov 0   ;;  %s1644_s18 = smov 0  }
   0xc   :  { %s1646_s19 = smov 0   ;;  %s1648_s20 = smov 0  }
   0xd LB: > { %s1669_s21 = sadd.s32 4294967295, %s1598_s20   ;;  %s1220_s22 = sadd.s32 4294967294, %s1598_s20   ;;  %s1598_s20 = sphi %s1648_s20, %s24_s20   ;;  %s1594_s19 = sphi %s1646_s19, %s2095_s19   ;;  %s1590_s18 = sphi %s1644_s18, %s2094_s18   ;;  %s1586_s17 = sphi %s1642_s17, %s2093_s17   ;;  %s1582_s16 = sphi %s1640_s16, %s2092_s16   ;;  %s1578_s15 = sphi %s1638_s15, %s2091_s15  }
   0xe   : > { %p58_p0 = scmp.ne.s32.totalorder %s1582_s16, %s1578_s15  ;;  %p2062_p1 = scmp.eq.s32.totalorder %s1669_s21, 0 }
   0xf   : > { %p160_p3 = scmp.eq.s32.totalorder %s1220_s22, 1  ;;  %p1221_p5 = scmp.ge.s32.totalorder %s1598_s20, 1 }
  0x10   : > { %p1678_p4 = por %p2062_p1, %p58_p0  ;;  %p167_p7 = scmp.lt.s32.totalorder %s1598_s20, 3 }
  0x11   : > { %p1683_p6 = por %p160_p3, %p58_p0  ;;  %s1600_s26 = smov [#allocation7]  }
  0x12   : > { %s2070_s23 = scalar_select %p1678_p4, 1, 0 }
  0x13   : > { %s2071_s24 = scalar_select %p1683_p6, 1, 0 }
  0x14   : > { %p1688_p8 = pnand %p1221_p5, %p167_p7  ;;  %s179_s27 = sshll.u32 %s1600_s26, 4  ;;  %s1692_s27 = int_to_ptr.vmem [resolvable:$true] %s179_s27 }
  0x15   : > { %s1601_s29 = smov [#allocation8]   ;;  %s2074_s2 = sld [smem:[#allocation18_spill]] }
  0x16   : > { %s2072_s25 = scalar_select %p1688_p8, 1, 0 }
  0x17   : > { %p1306_p9 = pneg %p1688_p8  ;;  %s193_s30 = sshll.u32 %s1601_s29, 4  ;;  %s1703_s30 = int_to_ptr.vmem [resolvable:$true] %s193_s30 }
  0x19   : > { %p1699_p11 = pnand %p1306_p9, %p2062_p1 }
  0x1b   : > { %s1388_s7 = scalar_lea.hbm %s2074_s2, 256  ;;  %p1390_p13 = pneg %p1699_p11 }
  0x1c   : > { %p1389_p12 = scmp.ne.s32.totalorder %s2074_s2, %s1388_s7  ;;  %p1395_p5 = scmp.lt.u32.totalorder %s1388_s7, %s2074_s2 }
  0x1e   : > { %p1391_p0 = pnand %p1390_p13, %p1389_p12 }
  0x20   : > { %p1392_p3 = pneg %p1391_p0 }
  0x22   : > { %p1397_p7 = pnand %p1395_p5, %p1392_p3 }
  0x24   : > { %1400 = shalt.err (!%p1397_p7)
}
  0x25   : > { %s1401_s12 = scalar_lea.vmem %s1692_s27, 256  ;;  %p1409_p2 = scmp.lt.s32.totalorder %s1692_s27, %s1692_s27 }
  0x26   : > { %p1402_p9 = scmp.ne.s32.totalorder %s1692_s27, %s1401_s12  ;;  %p1410_p12 = scmp.lt.s32.totalorder %s1401_s12, %s1401_s12 }
  0x28   : > { %p1404_p10 = pnand %p1402_p9, %p1390_p13  ;;  %p1411_p0 = por %p1410_p12, %p1409_p2 }
  0x2a   : > { %p1405_p1 = pneg %p1404_p10 }
  0x2c   : > { %p1412_p6 = pnand %p1411_p0, %p1405_p1 }
  0x2e   : > { %1415 = shalt.err (!%p1412_p6)
}
  0x2f   : > { %s1602_s13 = smov 64   ;;  %s1603_s14 = smov 4  }
  0x30   : > { %1309 = dma.hbm_to_vmem [thread:$0]  (!%p1699_p11), %s2074_s2, 256, %s1692_s27, [#allocation6], %s1602_s13, %s1602_s13, %s1603_s14  }
  0x31   : > { %s2075_s3 = sld [smem:[#allocation19_spill]] }
  0x37   : > { %s1416_s6 = scalar_lea.hbm %s2075_s3, 16 }
  0x38   : > { %p1417_p2 = scmp.ne.s32.totalorder %s2075_s3, %s1416_s6  ;;  %p1423_p10 = scmp.lt.u32.totalorder %s1416_s6, %s2075_s3 }
  0x3a   : > { %p1419_p1 = pnand %p1417_p2, %p1390_p13 }
  0x3c   : > { %p1420_p6 = pneg %p1419_p1 }
  0x3e   : > { %p1425_p3 = pnand %p1423_p10, %p1420_p6 }
  0x40   : > { %1428 = shalt.err (!%p1425_p3)
}
  0x41   : > { %s1429_s27 = scalar_lea.vmem %s1703_s30, 16  ;;  %s1436_s11 = scalar_lea.vmem %s1703_s30, 32 }
  0x42   : > { %p1430_p5 = scmp.ne.s32.totalorder %s1703_s30, %s1429_s27  ;;  %p1437_p12 = scmp.lt.s32.totalorder %s1703_s30, %s1703_s30 }
  0x43   : > { %p1438_p0 = scmp.lt.s32.totalorder %s1436_s11, %s1429_s27 }
  0x44   : > { %p1432_p7 = pnand %p1430_p5, %p1390_p13 }
  0x45   : > { %p1439_p2 = por %p1438_p0, %p1437_p12 }
  0x46   : > { %p1433_p9 = pneg %p1432_p7 }
  0x48   : > { %p1440_p1 = pnand %p1439_p2, %p1433_p9 }
  0x4a   : > { %1443 = shalt.err (!%p1440_p1)
}
  0x4b   : > { %1312 = dma.hbm_to_vmem [thread:$0]  (!%p1699_p11), %s2075_s3, 16, %s1703_s30, [#allocation9]  }
  0x4c   : > { %s36_s14 = sadd.s32 1, %s1594_s19  ;;  %s45_s22 = sadd.s32 1, %s1586_s17 }
  0x4d   : > { %p38_p13 = scmp.ge.s32.totalorder %s36_s14, 2  ;;  %p52_p6 = scmp.ne.s32.totalorder %s1586_s17, %s1582_s16 }
  0x4e   : > { %p53_p10 = scmp.eq.s32.totalorder %s1598_s20, 0  ;;  %p1326_p3 = scmp.lt.s32.totalorder %s1598_s20, 2 }
  0x4f   : > { %s2097_s14 = smov (%p38_p13, %s36_s14), 0  ;;  %p2077_p7 = scmp.eq.s32.totalorder %s1669_s21, 1 }
  0x50   : > { %2076 = sst [smem:[#allocation16_spill]] %s2097_s14  ;;  %p54_p5 = por %p53_p10, %p52_p6 }
  0x51   : > { %p1768_p9 = por %p2077_p7, %p52_p6  ;;  %s40_s26 = ssub.s32 %s1594_s19, %s2097_s14 }
  0x52   : > { %s1775_s29 = sand.u32 1, %s1586_s17   ;;  %p43_p11 = scmp.eq.s32.totalorder %s40_s26, 0 }
  0x53   : > { %s2078_s28 = scalar_select %p1768_p9, 1, 0 }
  0x54   : > { %s1225_s30 = sshll.u32 %s1775_s29, 4  ;;  %s1254_s5 = sshll.u32 %s1594_s19, 8 }
  0x55   : > { %s1780_s6 = scalar_select %p43_p11, %s1586_s17, %s45_s22  }
  0x56   : > { %s2079_s0 = sld [smem:[#allocation17_spill]]  ;;  %s208_s10 = scalar_lea.vmem [#allocation2], %s1225_s30 }
  0x57   : > { %s217_s27 = sshll.u32 %s208_s10, 4  ;;  %p1789_p12 = pnand %p1326_p3, %p54_p5  ;;  %s1793_s27 = int_to_ptr.vmem [resolvable:$true] %s217_s27 }
  0x58   : > { %s205_s12 = scalar_lea.sflag [#allocation3], %s1775_s29 }
  0x59   : > { %p1446_p2 = pneg %p1789_p12 }
  0x5c   : > { %s1785_s9 = scalar_lea.hbm %s2079_s0, %s1254_s5  ;;  %s1449_s30 = scalar_lea.hbm %s2079_s0, 512 }
  0x5d   : > { %s1444_s13 = scalar_lea.hbm %s1785_s9, 256  ;;  %p1450_p6 = scmp.lt.u32.totalorder %s1785_s9, %s2079_s0 }
  0x5e   : > { %p1445_p0 = scmp.ne.s32.totalorder %s1785_s9, %s1444_s13  ;;  %p1451_p10 = scmp.lt.u32.totalorder %s1449_s30, %s1444_s13 }
  0x5f   : > { %p1453_p5 = scmp.lt.u32.totalorder %s1444_s13, %s1785_s9 }
  0x60   : > { %p1447_p1 = pnand %p1446_p2, %p1445_p0  ;;  %p1452_p3 = por %p1451_p10, %p1450_p6 }
  0x62   : > { %p1448_p13 = pneg %p1447_p1  ;;  %p1454_p7 = por %p1453_p5, %p1452_p3 }
  0x64   : > { %p1455_p11 = pnand %p1454_p7, %p1448_p13 }
  0x66   : > { %1458 = shalt.err (!%p1455_p11)
}
  0x67   : > { %s1459_s8 = scalar_lea.vmem %s1793_s27, 256  ;;  %s1604_s10 = smov [#allocation2]  }
  0x68   : > { %p1460_p0 = scmp.ne.s32.totalorder %s1793_s27, %s1459_s8  ;;  %s1464_s22 = sshll.u32 %s1604_s10, 4  ;;  %s1465_s22 = int_to_ptr.vmem [resolvable:$false] %s1464_s22 }
  0x69   : > { %s1466_s26 = scalar_lea.vmem %s1465_s22, 512  ;;  %p1467_p4 = scmp.lt.s32.totalorder %s1793_s27, %s1465_s22 }
  0x6a   : > { %p1462_p1 = pnand %p1460_p0, %p1446_p2  ;;  %p1468_p6 = scmp.lt.s32.totalorder %s1466_s26, %s1459_s8 }
  0x6c   : > { %p1463_p9 = pneg %p1462_p1  ;;  %p1469_p10 = por %p1468_p6, %p1467_p4 }
  0x6e   : > { %p1470_p3 = pnand %p1469_p10, %p1463_p9 }
  0x70   : > { %1473 = shalt.err (!%p1470_p3)
}
  0x71   : > { %s1605_s13 = smov 128   ;;  %s1606_s30 = smov 8  }
  0x72   : > { %1316 = dma.hbm_to_vmem [thread:$0]  (!%p1789_p12), %s1785_s9, 256, %s1793_s27, %s205_s12, %s1605_s13, %s1605_s13, %s1606_s30  }
  0x73   : > { %s227_s5 = sand.u32 1, %s1598_s20   ;;  %s1228_s7 = sshll.u32 %s1775_s29, 1 }
  0x74   : > { %s1229_s10 = sshll.u32 %s1594_s19, 5  ;;  %s231_s8 = scalar_lea.vmem [#allocation5], %s1228_s7 }
  0x75   : > { %s239_s22 = sshll.u32 %s231_s8, 4  ;;  %s1829_s2 = scalar_lea.hbm %s2058_s1, %s1229_s10  ;;  %s240_s22 = int_to_ptr.vmem [resolvable:$true] %s239_s22 }
  0x76   : > { %s228_s3 = scalar_lea.sflag [#allocation6], %s227_s5  ;;  %s1474_s14 = scalar_lea.hbm %s1829_s2, 32 }
  0x77   : > { %p1475_p4 = scmp.ne.s32.totalorder %s1829_s2, %s1474_s14  ;;  %s1479_s27 = scalar_lea.hbm %s2058_s1, 64 }
  0x78   : > { %p1480_p5 = scmp.lt.u32.totalorder %s1829_s2, %s2058_s1  ;;  %p1481_p7 = scmp.lt.u32.totalorder %s1479_s27, %s1474_s14 }
  0x79   : > { %p1477_p9 = pnand %p1475_p4, %p1446_p2  ;;  %p1483_p0 = scmp.lt.u32.totalorder %s1474_s14, %s1829_s2 }
  0x7a   : > { %p1482_p11 = por %p1481_p7, %p1480_p5 }
  0x7b   : > { %p1478_p13 = pneg %p1477_p9 }
  0x7c   : > { %p1484_p1 = por %p1483_p0, %p1482_p11 }
  0x7e   : > { %p1485_p6 = pnand %p1484_p1, %p1478_p13 }
  0x80   : > { %1488 = shalt.err (!%p1485_p6)
}
  0x81   : > { %s1489_s13 = scalar_lea.vmem %s240_s22, 32  ;;  %s1607_s30 = smov [#allocation5]  }
  0x82   : > { %p1490_p10 = scmp.ne.s32.totalorder %s240_s22, %s1489_s13  ;;  %s1494_s5 = sshll.u32 %s1607_s30, 4  ;;  %s1495_s5 = int_to_ptr.vmem [resolvable:$false] %s1494_s5 }
  0x83   : > { %s1496_s7 = scalar_lea.vmem %s1495_s5, 64  ;;  %p1497_p9 = scmp.lt.s32.totalorder %s240_s22, %s1495_s5 }
  0x84   : > { %p1492_p3 = pnand %p1490_p10, %p1446_p2  ;;  %p1498_p8 = scmp.lt.s32.totalorder %s1496_s7, %s1489_s13 }
  0x86   : > { %p1493_p4 = pneg %p1492_p3  ;;  %p1499_p5 = por %p1498_p8, %p1497_p9 }
  0x88   : > { %p1500_p7 = pnand %p1499_p5, %p1493_p4 }
  0x8a   : > { %1503 = shalt.err (!%p1500_p7)
}
  0x8b   : > { %1319 = dma.hbm_to_vmem [thread:$0]  (!%p1789_p12), %s1829_s2, 32, %s240_s22, %s228_s3  }
  0x8c   : > { %p2081_p13 = scmp.ne.s32.totalorder %s2072_s25, 0 }
  0x8d   : > { %s1853_s14 = sand.u32 (!%p2081_p13), 1, %s1582_s16   ;;  %p2082_p2 = scmp.ne.s32.totalorder (!%p2081_p13), %s2070_s23, 0 }
  0x8e   : > { %248 = sbr.rel (%p2081_p13) target bundleno = 431 (0x1af), region = 36  ;;  %s1231_s10 = sshll.u32 (!%p2081_p13), %s1853_s14, 4 }
  0x8f   : > { %s251_s8 = scalar_lea.sflag (!%p2081_p13), [#allocation3], %s1853_s14  ;;  %s254_s26 = scalar_lea.vmem (!%p2081_p13), [#allocation2], %s1231_s10 }
  0x95   : > { %1557 = dma.done.wait (%p2082_p2), %s251_s8, 256  }
  0x96   : > { %1559 = vsyncadd (%p2082_p2), %s251_s8, 4294967040  ;;  %s259_s2 = sand.u32 1, %s1669_s21   ;;  %s1232_s3 = sshll.u32 %s1853_s14, 1 }
  0x97   : > { %s260_s25 = scalar_lea.sflag [#allocation6], %s259_s2  ;;  %s263_s11 = scalar_lea.vmem [#allocation5], %s1232_s3 }
  0x98   : > { %1561 = dma.done.wait (%p2082_p2), %s260_s25, 32  }
  0x99   : > { %1563 = vsyncadd (%p2082_p2), %s260_s25, 4294967264  ;;  %p2083_p8 = scmp.eq.s32.totalorder %s1669_s21, 0 }
  0x9b   : > { %1565 = dma.done.wait (%p2083_p8), [#allocation6], 256   ;;  %p2084_p12 = pmov %p2083_p8 }
  0x9c   : > { %p2085_p11 = pmov %p2083_p8 }
  0x9d   : > { %1567 = vsyncadd (%p2084_p12), [#allocation6], 4294967040 }
  0x9e   : > { %1569 = dma.done.wait (%p2085_p11), [#allocation9], 16   ;;  %p2086_p0 = pmov %p2083_p8 }
  0x9f   : > { %vm331_vm0 = vcmask 1043456   ;;  %vm326_vm1 = vcmask 31744   ;;  %v325_v0 = vld [vmem:[#allocation7 + $0x4] sm:$0xf]  ;;  %v303_v1 = vld [vmem:[%s254_s26] sm:$0xff]  ;;  %vm308_vm2 = vcmask 1040384   ;;  %v675_v18 = vlaneseq }
  0xa0   : > { %1571 = vsyncadd (%p2086_p0), [#allocation9], 4294967280  ;;  %v496_v2 = vld [vmem:[#allocation7 + $0xc] sm:$0xf]  ;;  %1268 = vmatprep.subr.msk.mxu0 %vm331_vm0, %v325_v0  ;;  %v309_v3 = vrot.slane %v303_v1, 7  ;;  %1270 = vmatprep.mubr.msk.f32.mxu0 %vm326_vm1, %v303_v1  ;;  %v304_v4 = vld [vmem:[%s254_s26 + $0x8] sm:$0xff] }
  0xa1   : > { %vm314_vm3 = vcmask 1046528   ;;  %v315_v5 = vrot.slane %v303_v1, 1  ;;  %v494_v6 = vld [vmem:[#allocation7 + $0x8] sm:$0xf]  ;;  %1269 = vmatpush3.msk.msra.mxu0 %vm331_vm0, %v325_v0  ;;  %1278 = vmatprep.subr.msk.mxu1 %vm331_vm0, %v496_v2  ;;  %v316_v7 = vrot.slane %v304_v4, 1  ;;  %v310_v12 = vrot.slane %v304_v4, 7 }
  0xa2   : > { %v305_v8 = vld [vmem:[%s263_s11] sm:$0x3]  ;;  %v323_v9 = vld [vmem:[#allocation7] sm:$0xf]  ;;  %1271 = vmatmul.mubr.msk.f32.vlgmr.msra.gmra.mrb[0].mxu0 %vm326_vm1, %v304_v4  ;;  %1279 = vmatpush3.msk.msra.mxu1 %vm331_vm0, %v496_v2  ;;  %v1608_v16 = vmov 1966171168  }
  0xa3   : > { %v320_v10 = vrot.slane %v305_v8, 2  ;;  %v313_v11 = vsel %vm308_vm2, %v305_v8, %v309_v3  ;;  %v317_v13 = vsel %vm314_vm3, %v315_v5, %v316_v7  ;;  %1283 = vmatprep.subr.msk.mxu1 %vm331_vm0, %v494_v6  ;;  %1273 = vmatprep.subr.msk.mxu0 %vm331_vm0, %v323_v9  ;;  %v311_v15 = vsel %vm308_vm2, %v309_v3, %v310_v12  ;;  %v1248_v23 = vld [vmem:[#allocation8] ss:$0 sm:$0xff]  ;;  %s1235_s21 = sshll.u32 %s1853_s14, 5  ;;  %s1255_s22 = sshll.u32 %s1590_s18, 9 }
  0xa4   : > { %1280 = vmatprep.mubr.msk.f32.mxu1 %vm326_vm1, %v317_v13  ;;  %1274 = vmatpush3.msk.msra.mxu0 %vm331_vm0, %v323_v9  ;;  %v673_v17 = vunpack.c.l.s4 %v1608_v16  ;;  %v676_v20 = vshrl.u32 %v675_v18, 7  ;;  %v1609_v21 = vmov 1983009808   ;;  %s300_s23 = scalar_lea.vmem [#allocation10], %s1235_s21  ;;  %s2004_s12 = scalar_lea.hbm %s2061_s4, %s1255_s22 }
  0xa5   : > { %v322_v14 = vsel %vm314_vm3, %v316_v7, %v320_v10  ;;  %1275 = vmatprep.mubr.msk.f32.mxu0 %vm326_vm1, %v313_v11  ;;  %v1000_v22 = vunpack.c.l.s4 %v1609_v21  ;;  %s1089_s29 = sshll.u32 %s300_s23, 4  ;;  %s1074_s18 = scalar_lea.sflag [#allocation4], %s1853_s14  ;;  %s2006_s29 = int_to_ptr.vmem [resolvable:$true] %s1089_s29 }
  0xa6   : > { %1281 = vmatmul.mubr.msk.f32.vlgmr.msra.gmra.mrb[0].mxu1 %vm326_vm1, %v322_v14  ;;  %v674_v19 = vunpack.c.0.s8 %v673_v17  ;;  %v1898_v33 = vsub.s32 0, %v676_v20  ;;  %s1504_s0 = scalar_lea.vmem %s2006_s29, 512  ;;  %p2087_p6 = scmp.ne.s32.totalorder %s2078_s28, 0 }
  0xa7   : > { %1284 = vmatpush3.msk.msra.mxu1 %vm331_vm0, %v494_v6  ;;  %1285 = vmatprep.mubr.msk.f32.mxu1 %vm326_vm1, %v303_v1  ;;  %v1001_v26 = vunpack.c.0.s8 %v1000_v22  ;;  %p1505_p1 = scmp.ne.s32.totalorder %s2006_s29, %s1504_s0  ;;  %s1610_s13 = smov [#allocation10]  }
  0xa8   : > { %v1895_v24 = vsub.s32 %v674_v19, %v676_v20  ;;  %s1508_s30 = sshll.u32 %s1610_s13, 4  ;;  %s1509_s30 = int_to_ptr.vmem [resolvable:$false] %s1508_s30 }
  0xa9   : > { %v1901_v37 = vsub.s32 %v1001_v26, %v676_v20  ;;  %p1506_p10 = pnand %p1505_p1, %p2087_p6  ;;  %s1510_s5 = scalar_lea.vmem %s1509_s30, 1024 }
  0xaa   : > { %1276 = vmatmul.mubr.msk.f32.vlgmr.msra.gmra.mrb[0].mxu0 %vm326_vm1, %v311_v15  ;;  %p1511_p4 = scmp.lt.s32.totalorder %s2006_s29, %s1509_s30  ;;  %p1512_p9 = scmp.lt.s32.totalorder %s1510_s5, %s1504_s0 }
  0xab   : > { %p1507_p3 = pneg %p1506_p10 }
  0xac   : > { %p1513_p5 = por %p1512_p9, %p1511_p4 }
  0xae   : > { %1286 = vmatmul.mubr.msk.f32.vlgmr.msra.gmra.mrb[0].mxu1 %vm326_vm1, %v304_v4  ;;  %p1514_p7 = pnand %p1513_p5, %p1507_p3 }
 0x17d   : > { %v1277_v25 = vpop.f32.mrb[0].mxu0 }
 0x17e   : > { %v666_v27 = vadd.f32 %v1277_v25, %v1248_v23  ;;  %v484_v28 = vpop.f32.mrb[1].mxu0 }
 0x17f   : > { %v665_v29 = vadd.f32 %v1248_v23, %v484_v28 }
 0x180   : > { %v720_v30 = vcombine.high %v666_v27, %v666_v27  ;;  %v727_v31 = vrot.slane %v666_v27, %v1895_v24 }
 0x181   : > { %v1287_v32 = vpop.f32.mrb[0].mxu1  ;;  %v671_v34 = vcombine.high %v665_v29, %v665_v29  ;;  %v678_v35 = vrot.slane %v665_v29, %v1895_v24 }
 0x182   : > { %v668_v36 = vadd.f32 %v1287_v32, %v1248_v23  ;;  %v649_v38 = vpop.f32.mrb[1].mxu1  ;;  %v734_v39 = vrot.slane %v720_v30, %v1895_v24  ;;  %v735_v40 = vcombine.high %v727_v31, %v727_v31  ;;  %v743_v41 = vrot.slane %v727_v31, %v1895_v24 }
 0x183   : > { %v667_v42 = vadd.f32 %v1248_v23, %v649_v38  ;;  %v685_v43 = vrot.slane %v671_v34, %v1895_v24  ;;  %v686_v44 = vcombine.high %v678_v35, %v678_v35  ;;  %v1907_v45 = vrot.slane %v678_v35, %v1895_v24 }
 0x184   : > { %v836_v46 = vcombine.high %v668_v36, %v668_v36  ;;  %v736_v47 = vcombine.high %v734_v39, %v734_v39  ;;  %v750_v48 = vrot.slane %v734_v39, %v1895_v24  ;;  %v757_v49 = vrot.slane %v735_v40, %v1895_v24 }
 0x185   : > { %v765_v50 = vcombine.high %v743_v41, %v743_v41  ;;  %v687_v51 = vcombine.high %v685_v43, %v685_v43  ;;  %v1912_v52 = vrot.slane %v685_v43, %v1895_v24  ;;  %v1915_v53 = vrot.slane %v686_v44, %v1895_v24 }
 0x186   : > { %v716_v54 = vcombine.high %v1907_v45, %v1907_v45  ;;  %v764_v55 = vrot.slane %v736_v47, %v1895_v24  ;;  %v766_v56 = vcombine.high %v750_v48, %v750_v48  ;;  %v767_v57 = vcombine.high %v757_v49, %v757_v49 }
 0x187   : > { %v843_v58 = vrot.slane %v668_v36, %v1895_v24  ;;  %v1922_v59 = vrot.slane %v687_v51, %v1895_v24  ;;  %v717_v60 = vcombine.high %v1912_v52, %v1912_v52  ;;  %v718_v61 = vcombine.high %v1915_v53, %v1915_v53 }
 0x188   : > { %v850_v62 = vrot.slane %v836_v46, %v1895_v24  ;;  %v768_v63 = vcombine.high %v764_v55, %v764_v55  ;;  %v787_v2 = vcombine.high %v667_v42, %v667_v42  ;;  %v794_v6 = vrot.slane %v667_v42, %v1895_v24 }
 0x189   : > { %v851_v0 = vcombine.high %v843_v58, %v843_v58  ;;  %v859_v1 = vrot.slane %v843_v58, %v1895_v24  ;;  %v719_v3 = vcombine.high %v1922_v59, %v1922_v59 }
 0x18a   : > { %v852_v4 = vcombine.high %v850_v62, %v850_v62  ;;  %v866_v5 = vrot.slane %v850_v62, %v1895_v24  ;;  %v801_v10 = vrot.slane %v787_v2, %v1895_v24  ;;  %v802_v14 = vcombine.high %v794_v6, %v794_v6 }
 0x18b   : > { %v873_v7 = vrot.slane %v851_v0, %v1895_v24  ;;  %v881_v8 = vcombine.high %v859_v1, %v859_v1  ;;  %v920_v9 = vrot.slane %v859_v1, %v1898_v33  ;;  %v810_v35 = vrot.slane %v794_v6, %v1895_v24 }
 0x18c   : > { %v880_v11 = vrot.slane %v852_v4, %v1895_v24  ;;  %v882_v12 = vcombine.high %v866_v5, %v866_v5  ;;  %v936_v13 = vrot.slane %v866_v5, %v1898_v33  ;;  %v803_v27 = vcombine.high %v801_v10, %v801_v10 }
 0x18d   : > { %v883_v15 = vcombine.high %v873_v7, %v873_v7  ;;  %v924_v16 = vrot.slane %v873_v7, %v1898_v33  ;;  %v928_v17 = vrot.slane %v881_v8, %v1898_v33  ;;  %v973_v18 = vsel %vm308_vm2, %v743_v41, %v920_v9 }
 0x18e   : > { %v884_v19 = vcombine.high %v880_v11, %v880_v11  ;;  %v940_v20 = vrot.slane %v880_v11, %v1898_v33  ;;  %v944_v21 = vrot.slane %v882_v12, %v1898_v33  ;;  %v977_v22 = vsel %vm308_vm2, %v750_v48, %v936_v13 }
 0x18f   : > { %v932_v23 = vrot.slane %v883_v15, %v1898_v33  ;;  %v974_v25 = vsel %vm308_vm2, %v757_v49, %v924_v16  ;;  %v975_v26 = vsel %vm308_vm2, %v765_v50, %v928_v17  ;;  %v817_v36 = vrot.slane %v801_v10, %v1895_v24 }
 0x190   : > { %v948_v28 = vrot.slane %v884_v19, %v1898_v33  ;;  %v978_v29 = vsel %vm308_vm2, %v764_v55, %v940_v20  ;;  %v979_v30 = vsel %vm308_vm2, %v766_v56, %v944_v21  ;;  %v1031_v31 = vcombine.low %v973_v18, %v974_v25 }
 0x191   : > { %v976_v32 = vsel %vm308_vm2, %v767_v57, %v932_v23  ;;  %v1048_v34 = vcombine.low %v977_v22, %v978_v29  ;;  %v824_v41 = vrot.slane %v802_v14, %v1895_v24  ;;  %v831_v44 = vrot.slane %v803_v27, %v1895_v24 }
 0x192   : > { %v980_v38 = vsel %vm308_vm2, %v768_v63, %v948_v28  ;;  %v1032_v39 = vcombine.low %v975_v26, %v976_v32  ;;  %v1039_v40 = vrot.slane %v1031_v31, %v1901_v37  ;;  %v832_v46 = vcombine.high %v810_v35, %v810_v35 }
 0x193   : > { %v1049_v42 = vcombine.low %v979_v30, %v980_v38  ;;  %v1056_v43 = vrot.slane %v1048_v34, %v1901_v37  ;;  %v833_v48 = vcombine.high %v817_v36, %v817_v36  ;;  %v834_v49 = vcombine.high %v824_v41, %v824_v41 }
 0x194   : > { %v1046_v47 = vrot.slane %v1032_v39, %v1901_v37  ;;  %v888_v50 = vrot.slane %v810_v35, %v1898_v33  ;;  %v835_v55 = vcombine.high %v831_v44, %v831_v44  ;;  %v892_v56 = vrot.slane %v824_v41, %v1898_v33 }
 0x195   : > { %v1063_v51 = vrot.slane %v1049_v42, %v1901_v37  ;;  %v896_v57 = vrot.slane %v832_v46, %v1898_v33  ;;  %v900_v62 = vrot.slane %v834_v49, %v1898_v33  ;;  %v904_v63 = vrot.slane %v817_v36, %v1898_v33 }
 0x196   : > { %v1047_v58 = vcombine.low %v1039_v40, %v1046_v47  ;;  %v908_v24 = vrot.slane %v831_v44, %v1898_v33  ;;  %v912_v1 = vrot.slane %v833_v48, %v1898_v33  ;;  %v916_v2 = vrot.slane %v835_v55, %v1898_v33 }
 0x197   : > { %v1064_v0 = vcombine.low %v1056_v43, %v1063_v51  ;;  %v965_v4 = vsel %vm308_vm2, %v1907_v45, %v888_v50  ;;  %v966_v5 = vsel %vm308_vm2, %v1915_v53, %v892_v56  ;;  %v967_v6 = vsel %vm308_vm2, %v716_v54, %v896_v57 }
 0x198   : > { %1071 = vst.msk [vmem:[%s300_s23 + $0x10] sm:$0xff] %vm326_vm1, %v1047_v58  ;;  %v968_v33 = vsel %vm308_vm2, %v718_v61, %v900_v62  ;;  %v969_v7 = vsel %vm308_vm2, %v1912_v52, %v904_v63  ;;  %v970_v8 = vsel %vm308_vm2, %v1922_v59, %v908_v24  ;;  %v971_v45 = vsel %vm308_vm2, %v717_v60, %v912_v1 }
 0x199   : > { %1072 = vst.msk [vmem:[%s300_s23 + $0x18] sm:$0xff] %vm326_vm1, %v1064_v0  ;;  %v972_v53 = vsel %vm308_vm2, %v719_v3, %v916_v2  ;;  %v997_v54 = vcombine.low %v965_v4, %v966_v5  ;;  %v998_v61 = vcombine.low %v967_v6, %v968_v33  ;;  %v1014_v9 = vcombine.low %v969_v7, %v970_v8 }
 0x19a   : > { %v1015_v10 = vcombine.low %v971_v45, %v972_v53 }
 0x19b   : > { %v1005_v11 = vrot.slane %v997_v54, %v1901_v37  ;;  %v1012_v12 = vrot.slane %v998_v61, %v1901_v37  ;;  %v1022_v52 = vrot.slane %v1014_v9, %v1901_v37 }
 0x19c   : > { %v1029_v60 = vrot.slane %v1015_v10, %v1901_v37 }
 0x19d   : > { %v1013_v59 = vcombine.low %v1005_v11, %v1012_v12 }
 0x19e   : > { %v1030_v3 = vcombine.low %v1022_v52, %v1029_v60 }
 0x19f   : > { %1069 = vst.msk [vmem:[%s300_s23] sm:$0xff] %vm326_vm1, %v1013_v59 }
 0x1a0   : > { %1070 = vst.msk [vmem:[%s300_s23 + $0x8] sm:$0xff] %vm326_vm1, %v1030_v3 }
 0x1a1   : > { %1517 = shalt.err (!%p1514_p7)
}
 0x1a2   : > { %s1518_s7 = scalar_lea.hbm %s2004_s12, 512  ;;  %s1522_s26 = scalar_lea.hbm %s2061_s4, 1024 }
 0x1a3   : > { %p1519_p13 = scmp.ne.s32.totalorder %s2004_s12, %s1518_s7  ;;  %p1523_p12 = scmp.lt.u32.totalorder %s2004_s12, %s2061_s4 }
 0x1a4   : > { %p1524_p11 = scmp.lt.u32.totalorder %s1522_s26, %s1518_s7  ;;  %p1526_p1 = scmp.lt.u32.totalorder %s1518_s7, %s2004_s12 }
 0x1a5   : > { %p1520_p2 = pnand %p1519_p13, %p2087_p6 }
 0x1a6   : > { %p1525_p0 = por %p1524_p11, %p1523_p12 }
 0x1a7   : > { %p1521_p8 = pneg %p1520_p2 }
 0x1a8   : > { %p1527_p10 = por %p1526_p1, %p1525_p0 }
 0x1aa   : > { %p1528_p3 = pnand %p1527_p10, %p1521_p8 }
 0x1ac   : > { %1531 = shalt.err (!%p1528_p3)
}
 0x1ad   : > { %s1611_s25 = smov 128   ;;  %s1612_s11 = smov 8  }
 0x1ae   : > { %1304 = dma.vmem_to_hbm [thread:$0]  (%p2087_p6), %s2006_s29, 512, %s2004_s12, %s1074_s18, %s1611_s25, %s1611_s25, %s1612_s11  }
 0x1af PF: > { %s1104_s21 = sand.u32 1, %s1578_s15   ;;  %p2088_p4 = scmp.ne.s32.totalorder %s2071_s24, 0 }
 0x1b0   : > { %p2089_p9 = scmp.ge.s32.totalorder %s1598_s20, 2  ;;  %s1105_s23 = scalar_lea.sflag [#allocation4], %s1104_s21 }
 0x1b2   : > { %p1321_p5 = pnand %p2089_p9, %p2088_p4 }
 0x1b4   : > { %1573 = dma.done.wait (!%p1321_p5), %s1105_s23, 512  }
 0x1b5   : > { %1575 = vsyncadd (!%p1321_p5), %s1105_s23, 4294966784  ;;  %s24_s20 = sadd.s32 1, %s1598_s20   ;;  %s2090_s28 = sld [smem:[#allocation16_spill]] }
 0x1b6   : > { %p21_p7 = scmp.ge.s32.totalorder %s24_s20, 4   ;;  %s2091_s15 = smov %s1582_s16 }
 0x1b7   : > { %s2092_s16 = smov %s1586_s17  ;;  %s2093_s17 = smov %s1780_s6 }
 0x1b8   : > { %s2094_s18 = smov %s1594_s19  ;;  %23 = sbr.rel (!%p21_p7) target bundleno = 13 (0xd), region = 105 }
 0x1bb   : > { %s2095_s19 = smov %s2090_s28 }
 0x1bf   :  { %1110 = vsyncpa [#allocation3], 1 }
 0x1c0   :  { %1112 = vsyncpa [#allocation3 + $0x1], 1 }
 0x1c1   :  { %1113 = vsyncpa [#allocation6], 1 }
 0x1c2   :  { %1115 = vsyncpa [#allocation6 + $0x1], 1 }
 0x1c3   :  { %1116 = vsyncpa [#allocation9], 1 }
 0x1c4   :  { %1117 = vsyncpa [#allocation4], 1 }
 0x1c5   :  { %1119 = vsyncpa [#allocation4 + $0x1], 1 }

</bundles_post_ra>
